<compile_context>
chip_gen: v7x
topology: tpu7x:2x2x1
jax: 0.10.0
libtpu: 0.0.40
codegen_flags: <defaults>
</compile_context>

<pallas_src>
import functools
import math

import jax
import jax.numpy as jnp
from jax import lax
from jax.experimental import pallas as pl
from jax.experimental.pallas import tpu as pltpu


def _embeddings_kernel(
    ids_ref,      # SMEM scalar prefetch: (batch*seq_pad,) int32 token ids
    sep_ref,      # SMEM scalar prefetch: (batch,) int32 first-SEP index (seq_len if none)
    tok_src,      # token table: raw HBM ref (pl.ANY) OR VMEM-resident full-table ref
    pos_ref,      # VMEM: (tile, d_model) positional rows for this seq tile
    segtab_ref,   # VMEM: (2, d_model) segment table (resident across steps)
    o_ref,        # VMEM out: (tile, d_model)
    tok_buf,      # VMEM scratch: (tile, d_model) gathered token rows
    sems,         # DMA semaphores: (tile,)
    *,
    seq_pad,
    tile,
    scale,
):
    t = pl.program_id(0)
    b = pl.program_id(1)
    base = b * seq_pad + t * tile
    unroll = min(tile, 8)

    # 1) Issue all token-row gather copies for this tile up front (unrolled so
    #    SMEM id reads / descriptor builds co-issue).  If tok_src is the
    #    VMEM-resident table these are cheap local copies; otherwise HBM DMAs.
    def _issue(s, carry):
        tid = ids_ref[base + s]
        pltpu.make_async_copy(
            tok_src.at[pl.ds(tid, 1), :],
            tok_buf.at[pl.ds(s, 1), :],
            sems.at[s],
        ).start()
        return carry

    lax.fori_loop(0, tile, _issue, None, unroll=unroll)

    # 2) VPU work that does not depend on the gathered rows — computed while the
    #    row copies are in flight.  Segment flag per row: 1.0 from the first SEP
    #    token onward, else 0.0 (iota compare against the prefetched SEP index;
    #    no lane-width-1 VMEM input needed).
    row = lax.broadcasted_iota(jnp.int32, (tile, 1), 0) + t * tile
    segf = (row >= sep_ref[b]).astype(jnp.float32)          # (tile, 1)
    seg0 = segtab_ref[0:1, :].astype(jnp.float32)            # (1, d_model)
    seg1 = segtab_ref[1:2, :].astype(jnp.float32)            # (1, d_model)
    pos = pos_ref[...].astype(jnp.float32)                   # (tile, d_model)
    # seg0 + f*(seg1-seg0) is exact for f in {0, 1}.
    base_sum = pos + seg0 + segf * (seg1 - seg0)

    # 3) Wait for the gathers.  The descriptor re-reads the same token id, so
    #    source slice and byte count exactly match the started copy.
    def _wait(s, carry):
        tid = ids_ref[base + s]
        pltpu.make_async_copy(
            tok_src.at[pl.ds(tid, 1), :],
            tok_buf.at[pl.ds(s, 1), :],
            sems.at[s],
        ).wait()
        return carry

    lax.fori_loop(0, tile, _wait, None, unroll=unroll)

    # TODO(synk): dedupe consecutive repeated token ids (padding) to skip copies.
    tok = tok_buf[...].astype(jnp.float32)
    o_ref[...] = ((tok + base_sum) * jnp.float32(scale)).astype(o_ref.dtype)


def _vmem_budgets():
    """(vmem_limit_bytes, seq-tile budget, resident-vocab-table cap), per chip gen."""
    try:
        cap = pltpu.get_tpu_info().vmem_capacity_bytes
    except Exception:
        cap = 64 * 1024 * 1024
    if cap <= 64 * 1024 * 1024:
        # v7x-class (64 MiB physical per core): leave headroom, small resident cap.
        return 48 * 1024 * 1024, 20 * 1024 * 1024, 10 * 1024 * 1024
    # v5e / v6e (128 MiB physical): bigger tiles + room for a resident vocab table.
    return 96 * 1024 * 1024, 44 * 1024 * 1024, 24 * 1024 * 1024


def _pick_seq_tile(seq_len, d_model, itemsize, tile_budget):
    """Largest seq tile that fits the budget (multiple of 8 when tiling)."""
    # tok_buf + double-buffered pos/out blocks + vreg/intermediate headroom, per row.
    per_row = 6 * d_model * max(itemsize, 4)
    max_rows = max(8, tile_budget // per_row)
    if seq_len <= max_rows:
        return seq_len                      # whole sequence in one tile
    return max(8, (min(max_rows, seq_len) // 8) * 8)


def embeddings_forward(x, sep_token, tok_table, pos_table, seg_table):
    """Forward pass of the PyTorch `Embeddings` module."""
    batch, seq_len = x.shape
    vocab, d_model = tok_table.shape
    assert pos_table.shape[0] >= seq_len and pos_table.shape[1] == d_model
    assert seg_table.shape == (2, d_model)

    out_dtype = tok_table.dtype
    itemsize = jnp.dtype(out_dtype).itemsize
    scale = math.sqrt(d_model)

    vmem_limit, tile_budget, resident_cap = _vmem_budgets()

    table_bytes = vocab * d_model * itemsize
    vocab_resident = table_bytes <= resident_cap
    if vocab_resident:
        # The pipelined full-table block may be double-buffered; budget for 2x.
        tile_budget = max(8 * 1024 * 1024, tile_budget - 2 * table_bytes)

    tile = _pick_seq_tile(seq_len, d_model, itemsize, tile_budget)
    seq_pad = seq_len if tile >= seq_len else -(-seq_len // tile) * tile
    n_t = seq_pad // tile

    # Per-row first-SEP index (seq_len if no SEP -> all-zero segment ids),
    # matching the PyTorch loop (segment id 1 from the first occurrence onward).
    is_sep = x == sep_token
    first_sep = jnp.where(
        jnp.any(is_sep, axis=1), jnp.argmax(is_sep, axis=1), seq_len
    ).astype(jnp.int32)

    x_ids = x.astype(jnp.int32)
    pos_rows = pos_table[:seq_len]
    if seq_pad != seq_len:
        pad = seq_pad - seq_len
        x_ids = jnp.pad(x_ids, ((0, 0), (0, pad)))          # pad with token 0 (valid row)
        pos_rows = jnp.pad(pos_rows, ((0, pad), (0, 0)))
    ids = x_ids.reshape(-1)
    # TODO(synk): for very large batch*seq the flat SMEM id array can exceed SMEM;
    # tile the id prefetch per grid step instead.

    if vocab_resident:
        # Full-array VMEM block with a constant index map: fetched once, resident.
        tok_spec = pl.BlockSpec((vocab, d_model), lambda t, b, ids, sep: (0, 0))
    else:
        # Leave the table in HBM and gather rows with manual DMAs.
        tok_spec = pl.BlockSpec(memory_space=pl.ANY)

    kernel = functools.partial(
        _embeddings_kernel, seq_pad=seq_pad, tile=tile, scale=scale
    )

    out = pl.pallas_call(
        kernel,
        out_shape=jax.ShapeDtypeStruct((batch, seq_pad, d_model), out_dtype),
        grid_spec=pltpu.PrefetchScalarGridSpec(
            num_scalar_prefetch=2,
            # batch innermost: the positional tile's block index (t, 0) stays
            # constant across consecutive steps, so Pallas skips re-DMAing it.
            grid=(n_t, batch),
            in_specs=[
                tok_spec,                                                   # token table
                pl.BlockSpec((tile, d_model), lambda t, b, ids, sep: (t, 0)),   # pos rows
                pl.BlockSpec((2, d_model), lambda t, b, ids, sep: (0, 0)),      # seg table
            ],
            out_specs=pl.BlockSpec(
                (None, tile, d_model), lambda t, b, ids, sep: (b, t, 0)
            ),
            scratch_shapes=[
                pltpu.VMEM((tile, d_model), out_dtype),
                pltpu.SemaphoreType.DMA((tile,)),
            ],
        ),
        compiler_params=pltpu.CompilerParams(
            dimension_semantics=("parallel", "parallel"),
            vmem_limit_bytes=vmem_limit,
        ),
    )(ids, first_sep, tok_table, pos_rows, seg_table)

    if seq_pad != seq_len:
        out = out[:, :seq_len, :]
    return out


if __name__ == "__main__":
    key = jax.random.PRNGKey(0)
    vocab_size, max_seq_len, d_model = 32, 16, 128
    batch, seq_len = 2, 8
    sep_token = 5

    k1, k2, k3, k4 = jax.random.split(key, 4)
    tok_table = jax.random.normal(k1, (vocab_size, d_model), dtype=jnp.float32)
    pos_table = jax.random.normal(k2, (max_seq_len, d_model), dtype=jnp.float32)
    seg_table = jax.random.normal(k3, (2, d_model), dtype=jnp.float32)

    x = jax.random.randint(k4, (batch, seq_len), 0, vocab_size, dtype=jnp.int32)
    # plant SEP tokens so the segment-embedding path is exercised
    x = x.at[0, 4].set(sep_token)
    x = x.at[1, 6].set(sep_token)

    out = embeddings_forward(x, sep_token, tok_table, pos_table, seg_table)
    out = jax.block_until_ready(out)

    # pure-JAX reference matching the PyTorch module exactly
    positions = jnp.arange(seq_len)
    seg_ids = (jnp.cumsum((x == sep_token).astype(jnp.int32), axis=1) > 0).astype(jnp.int32)
    ref = (
        tok_table[x] + pos_table[positions][None, :, :] + seg_table[seg_ids]
    ) * math.sqrt(d_model)

    assert out.shape == (batch, seq_len, d_model)
    assert jnp.allclose(out, ref, atol=1e-5, rtol=1e-5), "mismatch vs reference"
    print("KERNEL_OK")
</pallas_src>

<mosaic_0001>
module attributes {stable_mosaic.version = 11 : i64} {
  func.func @_embeddings_kernel(%arg0: i32, %arg1: i32, %arg2: memref<16xi32, #tpu.memory_space<smem>>, %arg3: memref<2xi32, #tpu.memory_space<smem>>, %arg4: memref<32x128xf32, #tpu.memory_space<vmem>>, %arg5: memref<8x128xf32, #tpu.memory_space<vmem>>, %arg6: memref<2x128xf32, #tpu.memory_space<vmem>>, %arg7: memref<1x8x128xf32, #tpu.memory_space<vmem>>, %arg8: memref<8x128xf32, #tpu.memory_space<vmem>>, %arg9: memref<8x!tpu.dma_semaphore, #tpu.memory_space<semaphore_mem>>) attributes {dimension_semantics = [#tpu.dimension_semantics<parallel>, #tpu.dimension_semantics<parallel>], iteration_bounds = array<i64: 1, 2>, scalar_prefetch = 2 : i64, scratch_operands = 2 : i64, tpu.core_type = #tpu.core_type<tc>, window_params = [{pipeline_mode = #tpu.pipeline_mode<synchronous>, transform_indices = @transform_0, window_bounds = array<i64: 32, 128>}, {transform_indices = @transform_1, window_bounds = array<i64: 8, 128>}, {pipeline_mode = #tpu.pipeline_mode<synchronous>, transform_indices = @transform_2, window_bounds = array<i64: 2, 128>}, {transform_indices = @transform_3, window_bounds = array<i64: 1, 8, 128>}]} {
    %c8_i32 = arith.constant 8 : i32
    %0 = arith.muli %arg1, %c8_i32 : i32
    %c8_i32_0 = arith.constant 8 : i32
    %1 = arith.muli %arg0, %c8_i32_0 : i32
    %2 = arith.addi %0, %1 : i32
    %c0_i32 = arith.constant 0 : i32
    %3 = arith.addi %2, %c0_i32 : i32
    %4 = arith.index_cast %3 : i32 to index
    %5 = memref.load %arg2[%4] : memref<16xi32, #tpu.memory_space<smem>>
    %c0_i32_1 = arith.constant 0 : i32
    %6 = tpu.memref_slice %arg4[%5, %c0_i32_1] : memref<32x128xf32, #tpu.memory_space<vmem>> -> memref<1x128xf32, #tpu.memory_space<vmem>>
    %c0_i32_2 = arith.constant 0 : i32
    %7 = tpu.memref_slice %arg8[%c0_i32, %c0_i32_2] : memref<8x128xf32, #tpu.memory_space<vmem>> -> memref<1x128xf32, #tpu.memory_space<vmem>>
    %8 = tpu.memref_slice %arg9[%c0_i32] : memref<8x!tpu.dma_semaphore, #tpu.memory_space<semaphore_mem>> -> memref<1x!tpu.dma_semaphore, #tpu.memory_space<semaphore_mem>>
    %9 = tpu.memref_squeeze %8 : memref<1x!tpu.dma_semaphore, #tpu.memory_space<semaphore_mem>> -> memref<!tpu.dma_semaphore, #tpu.memory_space<semaphore_mem>>
    tpu.enqueue_dma source(%6 : memref<1x128xf32, #tpu.memory_space<vmem>>) target(%7 : memref<1x128xf32, #tpu.memory_space<vmem>>) target_semaphore(%9 : memref<!tpu.dma_semaphore, #tpu.memory_space<semaphore_mem>>)
    %c1_i32 = arith.constant 1 : i32
    %10 = arith.addi %2, %c1_i32 : i32
    %11 = arith.index_cast %10 : i32 to index
    %12 = memref.load %arg2[%11] : memref<16xi32, #tpu.memory_space<smem>>
    %c0_i32_3 = arith.constant 0 : i32
    %13 = tpu.memref_slice %arg4[%12, %c0_i32_3] : memref<32x128xf32, #tpu.memory_space<vmem>> -> memref<1x128xf32, #tpu.memory_space<vmem>>
    %c0_i32_4 = arith.constant 0 : i32
    %14 = tpu.memref_slice %arg8[%c1_i32, %c0_i32_4] : memref<8x128xf32, #tpu.memory_space<vmem>> -> memref<1x128xf32, #tpu.memory_space<vmem>>
    %15 = tpu.memref_slice %arg9[%c1_i32] : memref<8x!tpu.dma_semaphore, #tpu.memory_space<semaphore_mem>> -> memref<1x!tpu.dma_semaphore, #tpu.memory_space<semaphore_mem>>
    %16 = tpu.memref_squeeze %15 : memref<1x!tpu.dma_semaphore, #tpu.memory_space<semaphore_mem>> -> memref<!tpu.dma_semaphore, #tpu.memory_space<semaphore_mem>>
    tpu.enqueue_dma source(%13 : memref<1x128xf32, #tpu.memory_space<vmem>>) target(%14 : memref<1x128xf32, #tpu.memory_space<vmem>>) target_semaphore(%16 : memref<!tpu.dma_semaphore, #tpu.memory_space<semaphore_mem>>)
    %c2_i32 = arith.constant 2 : i32
    %17 = arith.addi %2, %c2_i32 : i32
    %18 = arith.index_cast %17 : i32 to index
    %19 = memref.load %arg2[%18] : memref<16xi32, #tpu.memory_space<smem>>
    %c0_i32_5 = arith.constant 0 : i32
    %20 = tpu.memref_slice %arg4[%19, %c0_i32_5] : memref<32x128xf32, #tpu.memory_space<vmem>> -> memref<1x128xf32, #tpu.memory_space<vmem>>
    %c0_i32_6 = arith.constant 0 : i32
    %21 = tpu.memref_slice %arg8[%c2_i32, %c0_i32_6] : memref<8x128xf32, #tpu.memory_space<vmem>> -> memref<1x128xf32, #tpu.memory_space<vmem>>
    %22 = tpu.memref_slice %arg9[%c2_i32] : memref<8x!tpu.dma_semaphore, #tpu.memory_space<semaphore_mem>> -> memref<1x!tpu.dma_semaphore, #tpu.memory_space<semaphore_mem>>
    %23 = tpu.memref_squeeze %22 : memref<1x!tpu.dma_semaphore, #tpu.memory_space<semaphore_mem>> -> memref<!tpu.dma_semaphore, #tpu.memory_space<semaphore_mem>>
    tpu.enqueue_dma source(%20 : memref<1x128xf32, #tpu.memory_space<vmem>>) target(%21 : memref<1x128xf32, #tpu.memory_space<vmem>>) target_semaphore(%23 : memref<!tpu.dma_semaphore, #tpu.memory_space<semaphore_mem>>)
    %c3_i32 = arith.constant 3 : i32
    %24 = arith.addi %2, %c3_i32 : i32
    %25 = arith.index_cast %24 : i32 to index
    %26 = memref.load %arg2[%25] : memref<16xi32, #tpu.memory_space<smem>>
    %c0_i32_7 = arith.constant 0 : i32
    %27 = tpu.memref_slice %arg4[%26, %c0_i32_7] : memref<32x128xf32, #tpu.memory_space<vmem>> -> memref<1x128xf32, #tpu.memory_space<vmem>>
    %c0_i32_8 = arith.constant 0 : i32
    %28 = tpu.memref_slice %arg8[%c3_i32, %c0_i32_8] : memref<8x128xf32, #tpu.memory_space<vmem>> -> memref<1x128xf32, #tpu.memory_space<vmem>>
    %29 = tpu.memref_slice %arg9[%c3_i32] : memref<8x!tpu.dma_semaphore, #tpu.memory_space<semaphore_mem>> -> memref<1x!tpu.dma_semaphore, #tpu.memory_space<semaphore_mem>>
    %30 = tpu.memref_squeeze %29 : memref<1x!tpu.dma_semaphore, #tpu.memory_space<semaphore_mem>> -> memref<!tpu.dma_semaphore, #tpu.memory_space<semaphore_mem>>
    tpu.enqueue_dma source(%27 : memref<1x128xf32, #tpu.memory_space<vmem>>) target(%28 : memref<1x128xf32, #tpu.memory_space<vmem>>) target_semaphore(%30 : memref<!tpu.dma_semaphore, #tpu.memory_space<semaphore_mem>>)
    %c4_i32 = arith.constant 4 : i32
    %31 = arith.addi %2, %c4_i32 : i32
    %32 = arith.index_cast %31 : i32 to index
    %33 = memref.load %arg2[%32] : memref<16xi32, #tpu.memory_space<smem>>
    %c0_i32_9 = arith.constant 0 : i32
    %34 = tpu.memref_slice %arg4[%33, %c0_i32_9] : memref<32x128xf32, #tpu.memory_space<vmem>> -> memref<1x128xf32, #tpu.memory_space<vmem>>
    %c0_i32_10 = arith.constant 0 : i32
    %35 = tpu.memref_slice %arg8[%c4_i32, %c0_i32_10] : memref<8x128xf32, #tpu.memory_space<vmem>> -> memref<1x128xf32, #tpu.memory_space<vmem>>
    %36 = tpu.memref_slice %arg9[%c4_i32] : memref<8x!tpu.dma_semaphore, #tpu.memory_space<semaphore_mem>> -> memref<1x!tpu.dma_semaphore, #tpu.memory_space<semaphore_mem>>
    %37 = tpu.memref_squeeze %36 : memref<1x!tpu.dma_semaphore, #tpu.memory_space<semaphore_mem>> -> memref<!tpu.dma_semaphore, #tpu.memory_space<semaphore_mem>>
    tpu.enqueue_dma source(%34 : memref<1x128xf32, #tpu.memory_space<vmem>>) target(%35 : memref<1x128xf32, #tpu.memory_space<vmem>>) target_semaphore(%37 : memref<!tpu.dma_semaphore, #tpu.memory_space<semaphore_mem>>)
    %c5_i32 = arith.constant 5 : i32
    %38 = arith.addi %2, %c5_i32 : i32
    %39 = arith.index_cast %38 : i32 to index
    %40 = memref.load %arg2[%39] : memref<16xi32, #tpu.memory_space<smem>>
    %c0_i32_11 = arith.constant 0 : i32
    %41 = tpu.memref_slice %arg4[%40, %c0_i32_11] : memref<32x128xf32, #tpu.memory_space<vmem>> -> memref<1x128xf32, #tpu.memory_space<vmem>>
    %c0_i32_12 = arith.constant 0 : i32
    %42 = tpu.memref_slice %arg8[%c5_i32, %c0_i32_12] : memref<8x128xf32, #tpu.memory_space<vmem>> -> memref<1x128xf32, #tpu.memory_space<vmem>>
    %43 = tpu.memref_slice %arg9[%c5_i32] : memref<8x!tpu.dma_semaphore, #tpu.memory_space<semaphore_mem>> -> memref<1x!tpu.dma_semaphore, #tpu.memory_space<semaphore_mem>>
    %44 = tpu.memref_squeeze %43 : memref<1x!tpu.dma_semaphore, #tpu.memory_space<semaphore_mem>> -> memref<!tpu.dma_semaphore, #tpu.memory_space<semaphore_mem>>
    tpu.enqueue_dma source(%41 : memref<1x128xf32, #tpu.memory_space<vmem>>) target(%42 : memref<1x128xf32, #tpu.memory_space<vmem>>) target_semaphore(%44 : memref<!tpu.dma_semaphore, #tpu.memory_space<semaphore_mem>>)
    %c6_i32 = arith.constant 6 : i32
    %45 = arith.addi %2, %c6_i32 : i32
    %46 = arith.index_cast %45 : i32 to index
    %47 = memref.load %arg2[%46] : memref<16xi32, #tpu.memory_space<smem>>
    %c0_i32_13 = arith.constant 0 : i32
    %48 = tpu.memref_slice %arg4[%47, %c0_i32_13] : memref<32x128xf32, #tpu.memory_space<vmem>> -> memref<1x128xf32, #tpu.memory_space<vmem>>
    %c0_i32_14 = arith.constant 0 : i32
    %49 = tpu.memref_slice %arg8[%c6_i32, %c0_i32_14] : memref<8x128xf32, #tpu.memory_space<vmem>> -> memref<1x128xf32, #tpu.memory_space<vmem>>
    %50 = tpu.memref_slice %arg9[%c6_i32] : memref<8x!tpu.dma_semaphore, #tpu.memory_space<semaphore_mem>> -> memref<1x!tpu.dma_semaphore, #tpu.memory_space<semaphore_mem>>
    %51 = tpu.memref_squeeze %50 : memref<1x!tpu.dma_semaphore, #tpu.memory_space<semaphore_mem>> -> memref<!tpu.dma_semaphore, #tpu.memory_space<semaphore_mem>>
    tpu.enqueue_dma source(%48 : memref<1x128xf32, #tpu.memory_space<vmem>>) target(%49 : memref<1x128xf32, #tpu.memory_space<vmem>>) target_semaphore(%51 : memref<!tpu.dma_semaphore, #tpu.memory_space<semaphore_mem>>)
    %c7_i32 = arith.constant 7 : i32
    %52 = arith.addi %2, %c7_i32 : i32
    %53 = arith.index_cast %52 : i32 to index
    %54 = memref.load %arg2[%53] : memref<16xi32, #tpu.memory_space<smem>>
    %c0_i32_15 = arith.constant 0 : i32
    %55 = tpu.memref_slice %arg4[%54, %c0_i32_15] : memref<32x128xf32, #tpu.memory_space<vmem>> -> memref<1x128xf32, #tpu.memory_space<vmem>>
    %c0_i32_16 = arith.constant 0 : i32
    %56 = tpu.memref_slice %arg8[%c7_i32, %c0_i32_16] : memref<8x128xf32, #tpu.memory_space<vmem>> -> memref<1x128xf32, #tpu.memory_space<vmem>>
    %57 = tpu.memref_slice %arg9[%c7_i32] : memref<8x!tpu.dma_semaphore, #tpu.memory_space<semaphore_mem>> -> memref<1x!tpu.dma_semaphore, #tpu.memory_space<semaphore_mem>>
    %58 = tpu.memref_squeeze %57 : memref<1x!tpu.dma_semaphore, #tpu.memory_space<semaphore_mem>> -> memref<!tpu.dma_semaphore, #tpu.memory_space<semaphore_mem>>
    tpu.enqueue_dma source(%55 : memref<1x128xf32, #tpu.memory_space<vmem>>) target(%56 : memref<1x128xf32, #tpu.memory_space<vmem>>) target_semaphore(%58 : memref<!tpu.dma_semaphore, #tpu.memory_space<semaphore_mem>>)
    %c8_i32_17 = arith.constant 8 : i32
    %59 = tpu.iota {dimensions = array<i32: 0>} : vector<8x1xi32>
    %c8_i32_18 = arith.constant 8 : i32
    %60 = arith.muli %arg0, %c8_i32_18 : i32
    %61 = vector.broadcast %60 : i32 to vector<8x1xi32>
    %62 = arith.addi %59, %61 : vector<8x1xi32>
    %63 = arith.index_cast %arg1 : i32 to index
    %64 = memref.load %arg3[%63] : memref<2xi32, #tpu.memory_space<smem>>
    %65 = vector.broadcast %64 : i32 to vector<8x1xi32>
    %66 = arith.cmpi sge, %62, %65 : vector<8x1xi32>
    %67 = arith.extui %66 : vector<8x1xi1> to vector<8x1xi32>
    %68 = arith.sitofp %67 : vector<8x1xi32> to vector<8x1xf32>
    %c0 = arith.constant 0 : index
    %c0_19 = arith.constant 0 : index
    %69 = vector.load %arg6[%c0, %c0_19] : memref<2x128xf32, #tpu.memory_space<vmem>>, vector<1x128xf32>
    %c1 = arith.constant 1 : index
    %c0_20 = arith.constant 0 : index
    %70 = vector.load %arg6[%c1, %c0_20] : memref<2x128xf32, #tpu.memory_space<vmem>>, vector<1x128xf32>
    %c0_21 = arith.constant 0 : index
    %c0_22 = arith.constant 0 : index
    %71 = vector.load %arg5[%c0_21, %c0_22] : memref<8x128xf32, #tpu.memory_space<vmem>>, vector<8x128xf32>
    %72 = vector.broadcast %69 : vector<1x128xf32> to vector<8x128xf32>
    %73 = arith.addf %71, %72 : vector<8x128xf32>
    %74 = arith.subf %70, %69 : vector<1x128xf32>
    %75 = vector.broadcast %68 : vector<8x1xf32> to vector<8x128xf32>
    %76 = vector.broadcast %74 : vector<1x128xf32> to vector<8x128xf32>
    %77 = arith.mulf %75, %76 : vector<8x128xf32>
    %78 = arith.addf %73, %77 : vector<8x128xf32>
    %c0_i32_23 = arith.constant 0 : i32
    %79 = arith.addi %2, %c0_i32_23 : i32
    %80 = arith.index_cast %79 : i32 to index
    %81 = memref.load %arg2[%80] : memref<16xi32, #tpu.memory_space<smem>>
    %c0_i32_24 = arith.constant 0 : i32
    %82 = tpu.memref_slice %arg4[%81, %c0_i32_24] : memref<32x128xf32, #tpu.memory_space<vmem>> -> memref<1x128xf32, #tpu.memory_space<vmem>>
    %c0_i32_25 = arith.constant 0 : i32
    %83 = tpu.memref_slice %arg8[%c0_i32_23, %c0_i32_25] : memref<8x128xf32, #tpu.memory_space<vmem>> -> memref<1x128xf32, #tpu.memory_space<vmem>>
    %84 = tpu.memref_slice %arg9[%c0_i32_23] : memref<8x!tpu.dma_semaphore, #tpu.memory_space<semaphore_mem>> -> memref<1x!tpu.dma_semaphore, #tpu.memory_space<semaphore_mem>>
    %85 = tpu.memref_squeeze %84 : memref<1x!tpu.dma_semaphore, #tpu.memory_space<semaphore_mem>> -> memref<!tpu.dma_semaphore, #tpu.memory_space<semaphore_mem>>
    tpu.wait_dma2 semaphore(%85 : memref<!tpu.dma_semaphore, #tpu.memory_space<semaphore_mem>>) src(%82 : memref<1x128xf32, #tpu.memory_space<vmem>>) dst(%83 : memref<1x128xf32, #tpu.memory_space<vmem>>)
    %c1_i32_26 = arith.constant 1 : i32
    %86 = arith.addi %2, %c1_i32_26 : i32
    %87 = arith.index_cast %86 : i32 to index
    %88 = memref.load %arg2[%87] : memref<16xi32, #tpu.memory_space<smem>>
    %c0_i32_27 = arith.constant 0 : i32
    %89 = tpu.memref_slice %arg4[%88, %c0_i32_27] : memref<32x128xf32, #tpu.memory_space<vmem>> -> memref<1x128xf32, #tpu.memory_space<vmem>>
    %c0_i32_28 = arith.constant 0 : i32
    %90 = tpu.memref_slice %arg8[%c1_i32_26, %c0_i32_28] : memref<8x128xf32, #tpu.memory_space<vmem>> -> memref<1x128xf32, #tpu.memory_space<vmem>>
    %91 = tpu.memref_slice %arg9[%c1_i32_26] : memref<8x!tpu.dma_semaphore, #tpu.memory_space<semaphore_mem>> -> memref<1x!tpu.dma_semaphore, #tpu.memory_space<semaphore_mem>>
    %92 = tpu.memref_squeeze %91 : memref<1x!tpu.dma_semaphore, #tpu.memory_space<semaphore_mem>> -> memref<!tpu.dma_semaphore, #tpu.memory_space<semaphore_mem>>
    tpu.wait_dma2 semaphore(%92 : memref<!tpu.dma_semaphore, #tpu.memory_space<semaphore_mem>>) src(%89 : memref<1x128xf32, #tpu.memory_space<vmem>>) dst(%90 : memref<1x128xf32, #tpu.memory_space<vmem>>)
    %c2_i32_29 = arith.constant 2 : i32
    %93 = arith.addi %2, %c2_i32_29 : i32
    %94 = arith.index_cast %93 : i32 to index
    %95 = memref.load %arg2[%94] : memref<16xi32, #tpu.memory_space<smem>>
    %c0_i32_30 = arith.constant 0 : i32
    %96 = tpu.memref_slice %arg4[%95, %c0_i32_30] : memref<32x128xf32, #tpu.memory_space<vmem>> -> memref<1x128xf32, #tpu.memory_space<vmem>>
    %c0_i32_31 = arith.constant 0 : i32
    %97 = tpu.memref_slice %arg8[%c2_i32_29, %c0_i32_31] : memref<8x128xf32, #tpu.memory_space<vmem>> -> memref<1x128xf32, #tpu.memory_space<vmem>>
    %98 = tpu.memref_slice %arg9[%c2_i32_29] : memref<8x!tpu.dma_semaphore, #tpu.memory_space<semaphore_mem>> -> memref<1x!tpu.dma_semaphore, #tpu.memory_space<semaphore_mem>>
    %99 = tpu.memref_squeeze %98 : memref<1x!tpu.dma_semaphore, #tpu.memory_space<semaphore_mem>> -> memref<!tpu.dma_semaphore, #tpu.memory_space<semaphore_mem>>
    tpu.wait_dma2 semaphore(%99 : memref<!tpu.dma_semaphore, #tpu.memory_space<semaphore_mem>>) src(%96 : memref<1x128xf32, #tpu.memory_space<vmem>>) dst(%97 : memref<1x128xf32, #tpu.memory_space<vmem>>)
    %c3_i32_32 = arith.constant 3 : i32
    %100 = arith.addi %2, %c3_i32_32 : i32
    %101 = arith.index_cast %100 : i32 to index
    %102 = memref.load %arg2[%101] : memref<16xi32, #tpu.memory_space<smem>>
    %c0_i32_33 = arith.constant 0 : i32
    %103 = tpu.memref_slice %arg4[%102, %c0_i32_33] : memref<32x128xf32, #tpu.memory_space<vmem>> -> memref<1x128xf32, #tpu.memory_space<vmem>>
    %c0_i32_34 = arith.constant 0 : i32
    %104 = tpu.memref_slice %arg8[%c3_i32_32, %c0_i32_34] : memref<8x128xf32, #tpu.memory_space<vmem>> -> memref<1x128xf32, #tpu.memory_space<vmem>>
    %105 = tpu.memref_slice %arg9[%c3_i32_32] : memref<8x!tpu.dma_semaphore, #tpu.memory_space<semaphore_mem>> -> memref<1x!tpu.dma_semaphore, #tpu.memory_space<semaphore_mem>>
    %106 = tpu.memref_squeeze %105 : memref<1x!tpu.dma_semaphore, #tpu.memory_space<semaphore_mem>> -> memref<!tpu.dma_semaphore, #tpu.memory_space<semaphore_mem>>
    tpu.wait_dma2 semaphore(%106 : memref<!tpu.dma_semaphore, #tpu.memory_space<semaphore_mem>>) src(%103 : memref<1x128xf32, #tpu.memory_space<vmem>>) dst(%104 : memref<1x128xf32, #tpu.memory_space<vmem>>)
    %c4_i32_35 = arith.constant 4 : i32
    %107 = arith.addi %2, %c4_i32_35 : i32
    %108 = arith.index_cast %107 : i32 to index
    %109 = memref.load %arg2[%108] : memref<16xi32, #tpu.memory_space<smem>>
    %c0_i32_36 = arith.constant 0 : i32
    %110 = tpu.memref_slice %arg4[%109, %c0_i32_36] : memref<32x128xf32, #tpu.memory_space<vmem>> -> memref<1x128xf32, #tpu.memory_space<vmem>>
    %c0_i32_37 = arith.constant 0 : i32
    %111 = tpu.memref_slice %arg8[%c4_i32_35, %c0_i32_37] : memref<8x128xf32, #tpu.memory_space<vmem>> -> memref<1x128xf32, #tpu.memory_space<vmem>>
    %112 = tpu.memref_slice %arg9[%c4_i32_35] : memref<8x!tpu.dma_semaphore, #tpu.memory_space<semaphore_mem>> -> memref<1x!tpu.dma_semaphore, #tpu.memory_space<semaphore_mem>>
    %113 = tpu.memref_squeeze %112 : memref<1x!tpu.dma_semaphore, #tpu.memory_space<semaphore_mem>> -> memref<!tpu.dma_semaphore, #tpu.memory_space<semaphore_mem>>
    tpu.wait_dma2 semaphore(%113 : memref<!tpu.dma_semaphore, #tpu.memory_space<semaphore_mem>>) src(%110 : memref<1x128xf32, #tpu.memory_space<vmem>>) dst(%111 : memref<1x128xf32, #tpu.memory_space<vmem>>)
    %c5_i32_38 = arith.constant 5 : i32
    %114 = arith.addi %2, %c5_i32_38 : i32
    %115 = arith.index_cast %114 : i32 to index
    %116 = memref.load %arg2[%115] : memref<16xi32, #tpu.memory_space<smem>>
    %c0_i32_39 = arith.constant 0 : i32
    %117 = tpu.memref_slice %arg4[%116, %c0_i32_39] : memref<32x128xf32, #tpu.memory_space<vmem>> -> memref<1x128xf32, #tpu.memory_space<vmem>>
    %c0_i32_40 = arith.constant 0 : i32
    %118 = tpu.memref_slice %arg8[%c5_i32_38, %c0_i32_40] : memref<8x128xf32, #tpu.memory_space<vmem>> -> memref<1x128xf32, #tpu.memory_space<vmem>>
    %119 = tpu.memref_slice %arg9[%c5_i32_38] : memref<8x!tpu.dma_semaphore, #tpu.memory_space<semaphore_mem>> -> memref<1x!tpu.dma_semaphore, #tpu.memory_space<semaphore_mem>>
    %120 = tpu.memref_squeeze %119 : memref<1x!tpu.dma_semaphore, #tpu.memory_space<semaphore_mem>> -> memref<!tpu.dma_semaphore, #tpu.memory_space<semaphore_mem>>
    tpu.wait_dma2 semaphore(%120 : memref<!tpu.dma_semaphore, #tpu.memory_space<semaphore_mem>>) src(%117 : memref<1x128xf32, #tpu.memory_space<vmem>>) dst(%118 : memref<1x128xf32, #tpu.memory_space<vmem>>)
    %c6_i32_41 = arith.constant 6 : i32
    %121 = arith.addi %2, %c6_i32_41 : i32
    %122 = arith.index_cast %121 : i32 to index
    %123 = memref.load %arg2[%122] : memref<16xi32, #tpu.memory_space<smem>>
    %c0_i32_42 = arith.constant 0 : i32
    %124 = tpu.memref_slice %arg4[%123, %c0_i32_42] : memref<32x128xf32, #tpu.memory_space<vmem>> -> memref<1x128xf32, #tpu.memory_space<vmem>>
    %c0_i32_43 = arith.constant 0 : i32
    %125 = tpu.memref_slice %arg8[%c6_i32_41, %c0_i32_43] : memref<8x128xf32, #tpu.memory_space<vmem>> -> memref<1x128xf32, #tpu.memory_space<vmem>>
    %126 = tpu.memref_slice %arg9[%c6_i32_41] : memref<8x!tpu.dma_semaphore, #tpu.memory_space<semaphore_mem>> -> memref<1x!tpu.dma_semaphore, #tpu.memory_space<semaphore_mem>>
    %127 = tpu.memref_squeeze %126 : memref<1x!tpu.dma_semaphore, #tpu.memory_space<semaphore_mem>> -> memref<!tpu.dma_semaphore, #tpu.memory_space<semaphore_mem>>
    tpu.wait_dma2 semaphore(%127 : memref<!tpu.dma_semaphore, #tpu.memory_space<semaphore_mem>>) src(%124 : memref<1x128xf32, #tpu.memory_space<vmem>>) dst(%125 : memref<1x128xf32, #tpu.memory_space<vmem>>)
    %c7_i32_44 = arith.constant 7 : i32
    %128 = arith.addi %2, %c7_i32_44 : i32
    %129 = arith.index_cast %128 : i32 to index
    %130 = memref.load %arg2[%129] : memref<16xi32, #tpu.memory_space<smem>>
    %c0_i32_45 = arith.constant 0 : i32
    %131 = tpu.memref_slice %arg4[%130, %c0_i32_45] : memref<32x128xf32, #tpu.memory_space<vmem>> -> memref<1x128xf32, #tpu.memory_space<vmem>>
    %c0_i32_46 = arith.constant 0 : i32
    %132 = tpu.memref_slice %arg8[%c7_i32_44, %c0_i32_46] : memref<8x128xf32, #tpu.memory_space<vmem>> -> memref<1x128xf32, #tpu.memory_space<vmem>>
    %133 = tpu.memref_slice %arg9[%c7_i32_44] : memref<8x!tpu.dma_semaphore, #tpu.memory_space<semaphore_mem>> -> memref<1x!tpu.dma_semaphore, #tpu.memory_space<semaphore_mem>>
    %134 = tpu.memref_squeeze %133 : memref<1x!tpu.dma_semaphore, #tpu.memory_space<semaphore_mem>> -> memref<!tpu.dma_semaphore, #tpu.memory_space<semaphore_mem>>
    tpu.wait_dma2 semaphore(%134 : memref<!tpu.dma_semaphore, #tpu.memory_space<semaphore_mem>>) src(%131 : memref<1x128xf32, #tpu.memory_space<vmem>>) dst(%132 : memref<1x128xf32, #tpu.memory_space<vmem>>)
    %c8_i32_47 = arith.constant 8 : i32
    %c0_48 = arith.constant 0 : index
    %c0_49 = arith.constant 0 : index
    %135 = vector.load %arg8[%c0_48, %c0_49] : memref<8x128xf32, #tpu.memory_space<vmem>>, vector<8x128xf32>
    %136 = arith.addf %135, %78 : vector<8x128xf32>
    %cst = arith.constant 11.3137083 : f32
    %137 = vector.broadcast %cst : f32 to vector<8x128xf32>
    %138 = arith.mulf %136, %137 : vector<8x128xf32>
    %c0_50 = arith.constant 0 : index
    %c0_51 = arith.constant 0 : index
    %c0_52 = arith.constant 0 : index
    %139 = vector.load %arg7[%c0_50, %c0_51, %c0_52] : memref<1x8x128xf32, #tpu.memory_space<vmem>>, vector<1x8x128xf32>
    %140 = vector.shape_cast %139 : vector<1x8x128xf32> to vector<8x128xf32>
    %141 = vector.shape_cast %138 : vector<8x128xf32> to vector<1x8x128xf32>
    tpu.vector_store %arg7[%c0_50, %c0_51, %c0_52], %141 {strides = array<i32>} : memref<1x8x128xf32, #tpu.memory_space<vmem>>, vector<1x8x128xf32>,
    return
  }
  func.func @transform_0(%arg0: i32, %arg1: i32, %arg2: memref<16xi32, #tpu.memory_space<smem>>, %arg3: memref<2xi32, #tpu.memory_space<smem>>) -> (i32, i32) {
    %c0_i32 = arith.constant 0 : i32
    %c0_i32_0 = arith.constant 0 : i32
    %c0_i32_1 = arith.constant 0 : i32
    return %c0_i32, %c0_i32_0 : i32, i32
  }
  func.func @transform_1(%arg0: i32, %arg1: i32, %arg2: memref<16xi32, #tpu.memory_space<smem>>, %arg3: memref<2xi32, #tpu.memory_space<smem>>) -> (i32, i32) {
    %c0_i32 = arith.constant 0 : i32
    %c0_i32_0 = arith.constant 0 : i32
    return %arg0, %c0_i32 : i32, i32
  }
  func.func @transform_2(%arg0: i32, %arg1: i32, %arg2: memref<16xi32, #tpu.memory_space<smem>>, %arg3: memref<2xi32, #tpu.memory_space<smem>>) -> (i32, i32) {
    %c0_i32 = arith.constant 0 : i32
    %c0_i32_0 = arith.constant 0 : i32
    %c0_i32_1 = arith.constant 0 : i32
    return %c0_i32, %c0_i32_0 : i32, i32
  }
  func.func @transform_3(%arg0: i32, %arg1: i32, %arg2: memref<16xi32, #tpu.memory_space<smem>>, %arg3: memref<2xi32, #tpu.memory_space<smem>>) -> (i32, i32, i32) {
    %c0_i32 = arith.constant 0 : i32
    %c0_i32_0 = arith.constant 0 : i32
    return %arg1, %arg0, %c0_i32 : i32, i32, i32
  }
}

</mosaic_0001>

<bundles_post_ra>
// kernel: tpu_custom_call.1
= control target key start
LH: loop header
LB: loop body
LE: loop exit
PB: predicated region body
PF: predicated region fallthrough
CT: control target
= control target key end

     0   :  { %s1372_s0 = inlined_call_operand.hbm [shape: s32[16], index: 0, kind: input, shape index: {}]   ;;  %s1373_s2 = inlined_call_operand.hbm [shape: f32[32,128], index: 2, kind: input, shape index: {}]   ;;  %s1374_s3 = inlined_call_operand.vmem [shape: f32[8,128], index: 3, kind: input, shape index: {}]   ;;  %s1375_s4 = inlined_call_operand.vmem [shape: f32[2,128], index: 4, kind: input, shape index: {}]   ;;  %s1376_s5 = inlined_call_operand.hbm [shape: f32[2,8,128], index: 5, kind: output, shape index: {}]   ;;  %s1377_s1 = inlined_call_operand.vmem [shape: s32[2], index: 1, kind: input, shape index: {}]  }
   0x1   :  { %s991_s20 = scalar_lea.hbm %s1372_s0, 16 }
   0x2   :  { %p992_p0 = scmp.ne.s32.totalorder %s1372_s0, %s991_s20  ;;  %p995_p1 = scmp.lt.u32.totalorder %s991_s20, %s1372_s0 }
   0x4   :  { %p997_p2 = pnand %p995_p1, %p992_p0 }
   0x6   :  { %1000 = shalt.err (!%p997_p2)  }
   0x7   :  { %s1143_s25 = smov [#allocation5]   ;;  %s12_s30 = sshll.u32 %s1377_s1, 4  ;;  %s13_s30 = int_to_ptr.vmem [resolvable:$true] %s12_s30 }
   0x8   :  { %11 = dma.hbm_to_smem %s1372_s0, 16, %s1143_s25, [#allocation4] }
   0x9   :  { %s1001_s6 = scalar_lea.vmem %s13_s30, 16  ;;  %p1006_p4 = scmp.lt.s32.totalorder %s13_s30, %s13_s30 }
   0xa   :  { %p1002_p3 = scmp.ne.s32.totalorder %s13_s30, %s1001_s6  ;;  %p1007_p5 = scmp.lt.s32.totalorder %s1001_s6, %s1001_s6 }
   0xc   :  { %p1008_p6 = por %p1007_p5, %p1006_p4 }
   0xe   :  { %p1009_p7 = pnand %p1008_p6, %p1002_p3 }
  0x10   :  { %1012 = shalt.err (!%p1009_p7)  }
  0x11   :  { %s1144_s7 = smov [#allocation6]  }
  0x12   :  { %15 = dma.vmem_to_smem %s13_s30, 16, %s1144_s7, [#allocation4] }
  0x13   :  { %1093 = dma.done.wait [#allocation4], 32 }
  0x14   :  { %1094 = vsyncadd [#allocation4], 4294967264 }
  0x15   :  { %17 = sfence }
  0x16   :  { %18 = vsyncpa [#allocation8], 0 }
  0x17   :  { %19 = vsyncpa [#allocation9], 0 }
  0x18   :  { %21 = vsyncpa [#allocation9 + $0x1], 0  ;;  %s1195_s0 = smov 0   ;;  %s1197_s8 = smov 0  }
  0x19   :  { %s1199_s1 = smov 0   ;;  %s1201_s9 = smov 0  }
  0x1a   :  { %s1203_s10 = smov 0   ;;  %s1205_s11 = smov 0  }
  0x1b LB: > { %s898_s12 = sadd.s32 4294967295, %s1141_s11   ;;  %s899_s13 = sadd.s32 4294967294, %s1141_s11   ;;  %s1141_s11 = sphi %s1205_s11, %s27_s11   ;;  %s1137_s10 = sphi %s1203_s10, %s1395_s10   ;;  %s1133_s9 = sphi %s1201_s9, %s1394_s9   ;;  %s1129_s1 = sphi %s1199_s1, %s1393_s1   ;;  %s1125_s8 = sphi %s1197_s8, %s1392_s8   ;;  %s1121_s0 = sphi %s1195_s0, %s1391_s0  }
  0x1c   : > { %s36_s14 = sadd.s32 1, %s1137_s10  ;;  %s116_s15 = sadd.s32 1, %s1129_s1 }
  0x1d   : > { %p37_p8 = scmp.ge.s32.totalorder %s36_s14, 2  ;;  %p126_p9 = scmp.ne.s32.totalorder %s1129_s1, %s1125_s8 }
  0x1e   : > { %p127_p10 = scmp.eq.s32.totalorder %s898_s12, 1  ;;  %p132_p11 = scmp.ne.s32.totalorder %s1125_s8, %s1121_s0 }
  0x1f   : > { %s1397_s14 = smov (%p37_p8, %s36_s14), 0  ;;  %p133_p13 = scmp.eq.s32.totalorder %s899_s13, 1 }
  0x20   : > { %p1235_p12 = por %p127_p10, %p126_p9  ;;  %s111_s17 = ssub.s32 %s1137_s10, %s1397_s14 }
  0x21   : > { %p900_p0 = scmp.ge.s32.totalorder %s1141_s11, 1  ;;  %p114_p1 = scmp.eq.s32.totalorder %s111_s17, 0 }
  0x22   : > { %s1382_s16 = scalar_select %p1235_p12, 1, 0 }
  0x23   : > { %p1242_p2 = por %p133_p13, %p132_p11  ;;  %p140_p3 = scmp.lt.s32.totalorder %s1141_s11, 3 }
  0x24   : > { %s1248_s19 = scalar_select %p114_p1, %s1129_s1, %s116_s15  }
  0x25   : > { %s1383_s18 = scalar_select %p1242_p2, 1, 0 }
  0x26   : > { %p1250_p4 = pnand %p900_p0, %p140_p3  ;;  %p1254_p5 = scmp.eq.s32.totalorder %s898_s12, 0 }
  0x27   : > { %s1145_s22 = smov [#allocation7]   ;;  %s1013_s27 = scalar_lea.hbm %s1373_s2, 512 }
  0x28   : > { %s1384_s20 = scalar_select %p1250_p4, 1, 0 }
  0x29   : > { %s1385_s21 = scalar_select %p1254_p5, 1, 0 }
  0x2a   : > { %p926_p6 = pneg %p1250_p4  ;;  %s152_s23 = sshll.u32 %s1145_s22, 4  ;;  %s153_s23 = int_to_ptr.vmem [resolvable:$true] %s152_s23 }
  0x2b   : > { %p1014_p8 = scmp.ne.s32.totalorder %s1373_s2, %s1013_s27  ;;  %p1020_p13 = scmp.lt.u32.totalorder %s1013_s27, %s1373_s2 }
  0x2c   : > { %p1262_p7 = pnand %p1254_p5, %p926_p6 }
  0x2e   : > { %p1015_p9 = pneg %p1262_p7 }
  0x30   : > { %p1016_p10 = pnand %p1015_p9, %p1014_p8 }
  0x32   : > { %p1017_p11 = pneg %p1016_p10 }
  0x34   : > { %p1022_p0 = pnand %p1020_p13, %p1017_p11 }
  0x36   : > { %1025 = shalt.err (!%p1022_p0)
}
  0x37   : > { %s1026_s7 = scalar_lea.vmem %s153_s23, 512  ;;  %p1034_p2 = scmp.lt.s32.totalorder %s153_s23, %s153_s23 }
  0x38   : > { %p1027_p1 = scmp.ne.s32.totalorder %s153_s23, %s1026_s7  ;;  %p1035_p12 = scmp.lt.s32.totalorder %s1026_s7, %s1026_s7 }
  0x3a   : > { %p1029_p3 = pnand %p1027_p1, %p1015_p9  ;;  %p1036_p5 = por %p1035_p12, %p1034_p2 }
  0x3c   : > { %p1030_p6 = pneg %p1029_p3 }
  0x3e   : > { %p1037_p4 = pnand %p1036_p5, %p1030_p6 }
  0x40   : > { %1040 = shalt.err (!%p1037_p4)
}
  0x41   : > { %s1146_s12 = smov 128   ;;  %s1147_s13 = smov 8  }
  0x42   : > { %929 = dma.hbm_to_vmem [thread:$0]  (!%p1262_p7), %s1373_s2, 512, %s153_s23, [#allocation8], %s1146_s12, %s1146_s12, %s1147_s13  }
  0x43   : > { %p1387_p8 = scmp.ne.s32.totalorder %s1384_s20, 0 }
  0x44   : > { %p1388_p10 = scmp.ne.s32.totalorder (!%p1387_p8), %s1385_s21, 0 }
  0x45   : > { %178 = sbr.rel (%p1387_p8) target bundleno = 209 (0xd1), region = 32 }
  0x4c   : > { %1096 = dma.done.wait (%p1388_p10), [#allocation8], 512  }
  0x4d   : > { %1098 = vsyncadd (%p1388_p10), [#allocation8], 4294966784  ;;  %s1289_s22 = sshll.u32 %s1133_s9, 3  ;;  %s198_s24 = sand.u32 1, %s1125_s8  }
  0x4e   : > { %s208_s25 = sld [smem:[#allocation5 + %s1289_s22]]  ;;  %s1295_s26 = sshll.u32 %s198_s24, 3 }
  0x4f   : > { %s200_s23 = scalar_lea.vmem [#allocation10], %s1295_s26 }
  0x54   : > { %s209_s20 = scalar_lea.vmem [#allocation7], %s208_s25 }
  0x55   : > { %v227_v0 = vld [vmem:[%s209_s20] sm:$0x1] }
  0x56   : > { %228 = vst [vmem:[#allocation2] sm:$0x1] %v227_v0 }
  0x57   : > { %253 = vsyncadd [#allocation3], 16  ;;  %s254_s21 = sadd.s32 1, %s1289_s22 }
  0x58   : > { %s255_s27 = sld [smem:[#allocation5 + %s254_s21]] }
  0x5e   : > { %s256_s28 = scalar_lea.vmem [#allocation7], %s255_s27 }
  0x5f   : > { %v276_v1 = vld [vmem:[%s256_s28] sm:$0x1] }
  0x60   : > { %277 = vst [vmem:[#allocation2 + $0x1] sm:$0x1] %v276_v1 }
  0x61   : > { %302 = vsyncadd [#allocation3 + $0x1], 16  ;;  %s303_s29 = sadd.s32 2, %s1289_s22 }
  0x62   : > { %s304_s30 = sld [smem:[#allocation5 + %s303_s29]] }
  0x68   : > { %s305_s6 = scalar_lea.vmem [#allocation7], %s304_s30 }
  0x69   : > { %v325_v2 = vld [vmem:[%s305_s6] sm:$0x1] }
  0x6a   : > { %326 = vst [vmem:[#allocation2 + $0x2] sm:$0x1] %v325_v2 }
  0x6b   : > { %351 = vsyncadd [#allocation3 + $0x2], 16  ;;  %s352_s7 = sadd.s32 3, %s1289_s22 }
  0x6c   : > { %s353_s12 = sld [smem:[#allocation5 + %s352_s7]] }
  0x72   : > { %s354_s13 = scalar_lea.vmem [#allocation7], %s353_s12 }
  0x73   : > { %v374_v3 = vld [vmem:[%s354_s13] sm:$0x1] }
  0x74   : > { %375 = vst [vmem:[#allocation2 + $0x3] sm:$0x1] %v374_v3 }
  0x75   : > { %400 = vsyncadd [#allocation3 + $0x3], 16  ;;  %s401_s15 = sadd.s32 4, %s1289_s22 }
  0x76   : > { %s402_s17 = sld [smem:[#allocation5 + %s401_s15]] }
  0x7c   : > { %s403_s25 = scalar_lea.vmem [#allocation7], %s402_s17 }
  0x7d   : > { %v423_v4 = vld [vmem:[%s403_s25] sm:$0x1] }
  0x7e   : > { %424 = vst [vmem:[#allocation2 + $0x4] sm:$0x1] %v423_v4 }
  0x7f   : > { %449 = vsyncadd [#allocation3 + $0x4], 16  ;;  %s450_s20 = sadd.s32 5, %s1289_s22 }
  0x80   : > { %s451_s21 = sld [smem:[#allocation5 + %s450_s20]] }
  0x86   : > { %s452_s27 = scalar_lea.vmem [#allocation7], %s451_s21 }
  0x87   : > { %v472_v5 = vld [vmem:[%s452_s27] sm:$0x1] }
  0x88   : > { %473 = vst [vmem:[#allocation2 + $0x5] sm:$0x1] %v472_v5 }
  0x89   : > { %498 = vsyncadd [#allocation3 + $0x5], 16  ;;  %s499_s28 = sadd.s32 6, %s1289_s22 }
  0x8a   : > { %s500_s29 = sld [smem:[#allocation5 + %s499_s28]] }
  0x90   : > { %s501_s30 = scalar_lea.vmem [#allocation7], %s500_s29 }
  0x91   : > { %v521_v6 = vld [vmem:[%s501_s30] sm:$0x1] }
  0x92   : > { %522 = vst [vmem:[#allocation2 + $0x6] sm:$0x1] %v521_v6 }
  0x93   : > { %547 = vsyncadd [#allocation3 + $0x6], 16  ;;  %s548_s6 = sadd.s32 7, %s1289_s22 }
  0x94   : > { %s549_s7 = sld [smem:[#allocation5 + %s548_s6]] }
  0x9a   : > { %s550_s12 = scalar_lea.vmem [#allocation7], %s549_s7 }
  0x9b   : > { %v570_v7 = vld [vmem:[%s550_s12] sm:$0x1] }
  0x9c   : > { %571 = vst [vmem:[#allocation2 + $0x7] sm:$0x1] %v570_v7 }
  0x9d   : > { %596 = vsyncadd [#allocation3 + $0x7], 16  ;;  %v597_v8 = vlaneseq  ;;  %s601_s13 = sld [smem:[#allocation6 + %s1133_s9]]  ;;  %v606_v9 = vld [vmem:[%s1375_s4] sm:$0x1]  ;;  %v1148_v18 = vmov 0.0  }
  0x9e   : > { %v607_v10 = vld [vmem:[%s1375_s4 + $0x1] sm:$0x1] }
  0x9f   : > { %v598_v11 = vshrl.u32 %v597_v8, 7  ;;  %v614_v12 = vsub.f32 %v607_v10, %v606_v9  ;;  %v608_v14 = vld [vmem:[%s1374_s3] sm:$0xff] }
  0xa1   : > { %v611_v13 = vsub.s32 0, %v598_v11 }
  0xa3   : > { %v602_v15 = vstv %s601_s13  ;;  %v612_v16 = vrot.slane %v606_v9, %v611_v13  ;;  %v618_v17 = vrot.slane %v614_v12, %v611_v13 }
  0xa4   : > { %vm603_vm0 = vcmp.ge.s32.totalorder %v598_v11, %v602_v15 }
  0xa5   : > { %v907_v19 = vsel %vm603_vm0, 1.0, %v1148_v18  ;;  %v613_v20 = vadd.f32 %v612_v16, %v608_v14 }
  0xa6   : > { %v619_v21 = vmul.f32 %v907_v19, %v618_v17 }
  0xa8   : > { %v620_v22 = vadd.f32 %v619_v21, %v613_v20 }
  0xa9   : > { %1099 = dma.done.wait [#allocation3], 16 }
  0xaa   : > { %1100 = vsyncadd [#allocation3], 4294967280 }
  0xab   : > { %1101 = dma.done.wait [#allocation3 + $0x1], 16 }
  0xac   : > { %1102 = vsyncadd [#allocation3 + $0x1], 4294967280 }
  0xad   : > { %1103 = dma.done.wait [#allocation3 + $0x2], 16 }
  0xae   : > { %1104 = vsyncadd [#allocation3 + $0x2], 4294967280 }
  0xaf   : > { %1105 = dma.done.wait [#allocation3 + $0x3], 16 }
  0xb0   : > { %1106 = vsyncadd [#allocation3 + $0x3], 4294967280 }
  0xb1   : > { %1107 = dma.done.wait [#allocation3 + $0x4], 16 }
  0xb2   : > { %1108 = vsyncadd [#allocation3 + $0x4], 4294967280 }
  0xb3   : > { %1109 = dma.done.wait [#allocation3 + $0x5], 16 }
  0xb4   : > { %1110 = vsyncadd [#allocation3 + $0x5], 4294967280 }
  0xb5   : > { %1111 = dma.done.wait [#allocation3 + $0x6], 16 }
  0xb6   : > { %1112 = vsyncadd [#allocation3 + $0x6], 4294967280 }
  0xb7   : > { %1113 = dma.done.wait [#allocation3 + $0x7], 16 }
  0xb8   : > { %1114 = vsyncadd [#allocation3 + $0x7], 4294967280  ;;  %v646_v23 = vld [vmem:[#allocation2] sm:$0xff]  ;;  %s909_s27 = sshll.u32 %s1133_s9, 7  ;;  %s665_s28 = sshll.u32 %s200_s23, 4  ;;  %s1323_s28 = int_to_ptr.vmem [resolvable:$true] %s665_s28 }
  0xb9   : > { %v647_v24 = vadd.f32 %v646_v23, %v620_v22  ;;  %s1321_s6 = scalar_lea.hbm %s1376_s5, %s909_s27  ;;  %s651_s7 = scalar_lea.sflag [#allocation9], %s198_s24 }
  0xba   : > { %s1041_s12 = scalar_lea.vmem %s1323_s28, 128  ;;  %p1389_p2 = scmp.ne.s32.totalorder %s1382_s16, 0 }
  0xbb   : > { %v648_v25 = vmul.f32 11.313708, %v647_v24  ;;  %p1042_p12 = scmp.ne.s32.totalorder %s1323_s28, %s1041_s12  ;;  %s1149_s9 = smov [#allocation10]  }
  0xbc   : > { %s1045_s13 = sshll.u32 %s1149_s9, 4  ;;  %s1046_s13 = int_to_ptr.vmem [resolvable:$false] %s1045_s13 }
  0xbd   : > { %649 = vst [vmem:[%s200_s23] sm:$0xff] %v648_v25  ;;  %p1043_p4 = pnand %p1042_p12, %p1389_p2  ;;  %s1047_s15 = scalar_lea.vmem %s1046_s13, 256 }
  0xbe   : > { %p1048_p7 = scmp.lt.s32.totalorder %s1323_s28, %s1046_s13  ;;  %p1049_p9 = scmp.lt.s32.totalorder %s1047_s15, %s1041_s12 }
  0xbf   : > { %p1044_p5 = pneg %p1043_p4 }
  0xc0   : > { %p1050_p11 = por %p1049_p9, %p1048_p7 }
  0xc2   : > { %p1051_p13 = pnand %p1050_p11, %p1044_p5 }
  0xc4   : > { %1054 = shalt.err (!%p1051_p13)
}
  0xc5   : > { %s1055_s24 = scalar_lea.hbm %s1321_s6, 128  ;;  %s1059_s17 = scalar_lea.hbm %s1376_s5, 256 }
  0xc6   : > { %p1056_p0 = scmp.ne.s32.totalorder %s1321_s6, %s1055_s24  ;;  %p1060_p6 = scmp.lt.u32.totalorder %s1321_s6, %s1376_s5 }
  0xc7   : > { %p1061_p8 = scmp.lt.u32.totalorder %s1059_s17, %s1055_s24  ;;  %p1063_p12 = scmp.lt.u32.totalorder %s1055_s24, %s1321_s6 }
  0xc8   : > { %p1057_p1 = pnand %p1056_p0, %p1389_p2 }
  0xc9   : > { %p1062_p10 = por %p1061_p8, %p1060_p6 }
  0xca   : > { %p1058_p3 = pneg %p1057_p1 }
  0xcb   : > { %p1064_p4 = por %p1063_p12, %p1062_p10 }
  0xcd   : > { %p1065_p5 = pnand %p1064_p4, %p1058_p3 }
  0xcf   : > { %1068 = shalt.err (!%p1065_p5)
}
  0xd0   : > { %924 = dma.vmem_to_hbm [thread:$0]  (%p1389_p2), %s1323_s28, 128, %s1321_s6, %s651_s7  }
  0xd1 PF: > { %p936_p7 = scmp.ge.s32.totalorder %s1141_s11, 2  ;;  %s677_s22 = sand.u32 1, %s1121_s0  }
  0xd2   : > { %p1390_p9 = scmp.ne.s32.totalorder %s1383_s18, 0  ;;  %s678_s21 = scalar_lea.sflag [#allocation9], %s677_s22 }
  0xd4   : > { %p931_p11 = pnand %p936_p7, %p1390_p9 }
  0xd6   : > { %1116 = dma.done.wait (!%p931_p11), %s678_s21, 128  }
  0xd7   : > { %1118 = vsyncadd (!%p931_p11), %s678_s21, 4294967168  ;;  %s27_s11 = sadd.s32 1, %s1141_s11   ;;  %s1391_s0 = smov %s1125_s8 }
  0xd8   : > { %p24_p13 = scmp.ge.s32.totalorder %s27_s11, 4   ;;  %s1392_s8 = smov %s1129_s1 }
  0xd9   : > { %s1393_s1 = smov %s1248_s19  ;;  %s1394_s9 = smov %s1137_s10 }
  0xda   : > { %s1395_s10 = smov %s1397_s14  ;;  %26 = sbr.rel (!%p24_p13) target bundleno = 27 (0x1b), region = 421 }
  0xe1   :  { %683 = vsyncpa [#allocation8], 1 }
  0xe2   :  { %685 = vsyncpa [#allocation8 + $0x1], 1 }
  0xe3   :  { %686 = vsyncpa [#allocation9], 1 }
  0xe4   :  { %688 = vsyncpa [#allocation9 + $0x1], 1 }
  0xe5   :  { %689 = vsyncmov [#allocation3] }
  0xe8   :  { %s690_s16 = vpop.sfrf %689 }
  0xe9   :  { %p912_p2 = scmp.ne.s32.totalorder %s690_s16, 0 }
  0xeb   :  { %694 = shalt.err (%p912_p2)  }
  0xec   :  { %696 = vsyncmov [#allocation3 + $0x1] }
  0xef   :  { %s697_s18 = vpop.sfrf %696 }
  0xf0   :  { %p913_p0 = scmp.ne.s32.totalorder %s697_s18, 0 }
  0xf2   :  { %701 = shalt.err (%p913_p0)  }
  0xf3   :  { %703 = vsyncmov [#allocation3 + $0x2] }
  0xf6   :  { %s704_s19 = vpop.sfrf %703 }
  0xf7   :  { %p914_p1 = scmp.ne.s32.totalorder %s704_s19, 0 }
  0xf9   :  { %708 = shalt.err (%p914_p1)  }
  0xfa   :  { %710 = vsyncmov [#allocation3 + $0x3] }
  0xfd   :  { %s711_s14 = vpop.sfrf %710 }
  0xfe   :  { %p915_p3 = scmp.ne.s32.totalorder %s711_s14, 0 }
 0x100   :  { %715 = shalt.err (%p915_p3)  }
 0x101   :  { %717 = vsyncmov [#allocation3 + $0x4] }
 0x104   :  { %s718_s2 = vpop.sfrf %717 }
 0x105   :  { %p916_p6 = scmp.ne.s32.totalorder %s718_s2, 0 }
 0x107   :  { %722 = shalt.err (%p916_p6)  }
 0x108   :  { %724 = vsyncmov [#allocation3 + $0x5] }
 0x10b   :  { %s725_s3 = vpop.sfrf %724 }
 0x10c   :  { %p917_p8 = scmp.ne.s32.totalorder %s725_s3, 0 }
 0x10e   :  { %729 = shalt.err (%p917_p8)  }
 0x10f   :  { %731 = vsyncmov [#allocation3 + $0x6] }
 0x112   :  { %s732_s4 = vpop.sfrf %731 }
 0x113   :  { %p918_p10 = scmp.ne.s32.totalorder %s732_s4, 0 }
 0x115   :  { %736 = shalt.err (%p918_p10)  }
 0x116   :  { %738 = vsyncmov [#allocation3 + $0x7] }
 0x119   :  { %s739_s5 = vpop.sfrf %738 }
 0x11a   :  { %p919_p12 = scmp.ne.s32.totalorder %s739_s5, 0 }
 0x11c   :  { %743 = shalt.err (%p919_p12)  }

</bundles_post_ra>
